<compile_context>
chip_gen: v6e
topology: v6e:2x2x1
jax: 0.10.0
libtpu: 0.0.40
codegen_flags: <defaults>
</compile_context>

<pallas_src>
import functools

import jax
import jax.numpy as jnp
from jax.experimental import pallas as pl
from jax.experimental.pallas import tpu as pltpu


def _gather_kernel(idx_ref, params_hbm, out_ref, sems, *, gid, rows_per_step, batch):
    """Gather up to rows_per_step rows of params[idx, gid] into the output block.

    idx_ref:    SMEM (padded_batch,) int32 — scalar-prefetched gather indices.
    params_hbm: HBM ref (num_images, num_gradient, C*H*W) (memory_space=ANY).
    out_ref:    VMEM output block (rows_per_step, C*H*W), pipelined.
    sems:       DMA semaphores, shape (rows_per_step,).
    """
    base = pl.program_id(0) * rows_per_step
    not_last = pl.program_id(0) != pl.num_programs(0) - 1

    # One descriptor per row, reused for start() and wait().  idx is padded to
    # the grid size, so these SMEM reads are always in bounds; rows falling
    # past `batch` simply never have their DMA started.
    copies = [
        pltpu.make_async_copy(
            params_hbm.at[idx_ref[base + j], gid],
            out_ref.at[j],
            sems.at[j],
        )
        for j in range(rows_per_step)
    ]

    # Rows [0, full) are valid on every grid step; rows [full, rows_per_step)
    # exist only on non-final steps (tail guard -> skip wasted HBM reads).
    full = batch % rows_per_step or rows_per_step

    # Issue every row DMA first so they are all in flight concurrently ...
    for j in range(full):
        copies[j].start()
    if full < rows_per_step:
        @pl.when(not_last)
        def _start_tail():
            for j in range(full, rows_per_step):
                copies[j].start()

    # ... then wait on the same descriptors before the block is written back.
    for j in range(full):
        copies[j].wait()
    if full < rows_per_step:
        @pl.when(not_last)
        def _wait_tail():
            for j in range(full, rows_per_step):
                copies[j].wait()


def _pick_rows_per_step(batch, row_bytes):
    """Rows gathered per grid step: multiple of 8, ~2 MiB blocks, clamped to
    [8, 128], never exceeding the (rounded-up) batch, and capped so the grid
    has >=2 steps when the batch allows (v7x dual-TensorCore)."""
    target_block_bytes = 2 << 20
    k = (target_block_bytes // row_bytes) // 8 * 8
    k = max(8, min(128, k))
    k = min(k, ((batch + 7) // 8) * 8)          # don't exceed the batch
    if batch > 8:                                # keep >= 2 grid steps
        half = (batch + 1) // 2
        k = min(k, max(8, ((half + 7) // 8) * 8))
    return k


def gradient_config_forward(params, idx, gradient_id=1, mode="train", key=None):
    """params: (num_images, num_gradient, 3, H, W); idx: (B,) int.

    Returns params[idx, gradient_id] with shape (B', 3, H, W), where B' = B in
    'train' mode and min(B, num_images) in 'sample' mode (torch semantics of
    torch.randperm(num_images)[:B]).
    """
    num_images, num_gradient, c, h, w = params.shape
    chw = c * h * w

    if mode == "sample":
        # Glue (not the hot path): random permutation prefix, like torch.randperm.
        if key is None:
            raise ValueError("mode='sample' requires an explicit PRNG key")
        idx = jax.random.permutation(key, num_images)[: idx.shape[0]]
    idx = idx.astype(jnp.int32)

    # Recompute after the possible replacement: sample mode with
    # batch > num_images yields only num_images rows (matches torch).
    batch = idx.shape[0]

    gid = int(gradient_id)
    if not 0 <= gid < num_gradient:
        raise ValueError(f"gradient_id {gid} out of range [0, {num_gradient})")

    # Guard: an out-of-range idx would otherwise drive an out-of-bounds DMA.
    idx = jnp.clip(idx, 0, num_images - 1)

    itemsize = params.dtype.itemsize
    row_bytes = chw * itemsize
    k = _pick_rows_per_step(batch, row_bytes)
    num_steps = -(-batch // k)
    padded_batch = num_steps * k

    # Pad idx so in-kernel SMEM reads for tail rows stay in bounds (those rows'
    # DMAs are guarded off, so no HBM bandwidth is wasted on them).
    if padded_batch != batch:
        idx = jnp.concatenate([idx, jnp.zeros((padded_batch - batch,), jnp.int32)])

    # Lane-dense layout: collapse (3, H, W) -> C*H*W (free reshape of a
    # contiguous array) so each gathered row is one contiguous DMA.
    params_flat = params.reshape(num_images, num_gradient, chw)

    block_bytes = k * row_bytes
    # TODO(synk): for very large rows (e.g. image_size >= 1024 -> 12 MiB/row) add a
    # second grid axis tiling chw in 128-multiples so blocks fit v7x's 64 MiB VMEM.

    # Deeper output pipeline only pays off with more than one grid step.
    out_index_map = lambda i, idx_sref: (i, 0)
    if num_steps >= 2:
        out_spec = pl.BlockSpec((k, chw), out_index_map,
                                pipeline_mode=pl.Buffered(3))
        n_out_bufs = 3
    else:
        out_spec = pl.BlockSpec((k, chw), out_index_map)
        n_out_bufs = 2

    # Raise the scoped-VMEM cap only when the block footprint would be tight on
    # the smallest default (16 MiB on v5e).
    needed = (n_out_bufs + 1) * block_bytes + (1 << 20)
    vmem_limit = needed if needed > (16 << 20) else None

    kernel = functools.partial(
        _gather_kernel, gid=gid, rows_per_step=k, batch=batch)

    out_flat = pl.pallas_call(
        kernel,
        out_shape=jax.ShapeDtypeStruct((padded_batch, chw), params.dtype),
        grid_spec=pltpu.PrefetchScalarGridSpec(
            num_scalar_prefetch=1,
            grid=(num_steps,),
            in_specs=[pl.BlockSpec(memory_space=pl.ANY)],  # params stay in HBM
            out_specs=out_spec,
            scratch_shapes=[pltpu.SemaphoreType.DMA((k,))],
        ),
        compiler_params=pltpu.CompilerParams(
            dimension_semantics=("parallel",),  # rows independent -> v7x 2 TCs
            vmem_limit_bytes=vmem_limit,
        ),
        cost_estimate=pl.CostEstimate(
            flops=0, transcendentals=0,
            bytes_accessed=2 * batch * row_bytes),  # read + write, tail skipped
    )(idx, params_flat)

    return out_flat[:batch].reshape(batch, c, h, w)


if __name__ == "__main__":
    # Small, deterministic setup consistent with the module:
    #   num_images=8, num_gradient=2, image_size=16
    num_images, num_gradient, image_size = 8, 2, 16

    key = jax.random.PRNGKey(0)
    k_params, k_idx, k_idx2, k_sample = jax.random.split(key, 4)

    # Deterministic "randn" parameter init (same shape as the nn.Parameter).
    params = jax.random.normal(
        k_params, (num_images, num_gradient, 3, image_size, image_size),
        jnp.float32)

    # Case 1: batch=2 -> single grid step, partial tail.
    idx = jax.random.randint(k_idx, (2,), 0, num_images, jnp.int32)
    out = jax.block_until_ready(
        gradient_config_forward(params, idx, gradient_id=1, mode="train"))
    assert out.shape == (2, 3, image_size, image_size)
    assert jnp.array_equal(out, params[idx, 1])

    # Case 2: batch=11 -> 2 grid steps, triple-buffered output, tail guard.
    idx2 = jax.random.randint(k_idx2, (11,), 0, num_images, jnp.int32)
    out2 = jax.block_until_ready(
        gradient_config_forward(params, idx2, gradient_id=0, mode="train"))
    assert out2.shape == (11, 3, image_size, image_size)
    assert jnp.array_equal(out2, params[idx2, 0])

    # Case 3: 'sample' mode — indices come from a permutation of the given key.
    out3 = jax.block_until_ready(
        gradient_config_forward(params, idx, gradient_id=1, mode="sample",
                                key=k_sample))
    perm = jax.random.permutation(k_sample, num_images)[:2]
    assert out3.shape == (2, 3, image_size, image_size)
    assert jnp.array_equal(out3, params[perm, 1])

    print("KERNEL_OK")
</pallas_src>

<mosaic_0001>
module attributes {stable_mosaic.version = 11 : i64} {
  func.func @_gather_kernel(%arg0: i32, %arg1: memref<8xi32, #tpu.memory_space<smem>>, %arg2: memref<8x2x768xf32, #tpu.memory_space<any>>, %arg3: memref<8x768xf32, #tpu.memory_space<vmem>>, %arg4: memref<8x!tpu.dma_semaphore, #tpu.memory_space<semaphore_mem>>) attributes {dimension_semantics = [#tpu.dimension_semantics<parallel>], iteration_bounds = array<i64: 1>, scalar_prefetch = 1 : i64, scratch_operands = 1 : i64, tpu.core_type = #tpu.core_type<tc>, window_params = [{}, {transform_indices = @transform_1, window_bounds = array<i64: 8, 768>}]} {
    %c8_i32 = arith.constant 8 : i32
    %0 = arith.muli %arg0, %c8_i32 : i32
    %c0_i32 = arith.constant 0 : i32
    %1 = arith.cmpi ne, %arg0, %c0_i32 : i32
    %c0_i32_0 = arith.constant 0 : i32
    %2 = arith.addi %0, %c0_i32_0 : i32
    %3 = arith.index_cast %2 : i32 to index
    %4 = memref.load %arg1[%3] : memref<8xi32, #tpu.memory_space<smem>>
    %c1_i32 = arith.constant 1 : i32
    %5 = arith.addi %0, %c1_i32 : i32
    %6 = arith.index_cast %5 : i32 to index
    %7 = memref.load %arg1[%6] : memref<8xi32, #tpu.memory_space<smem>>
    %c2_i32 = arith.constant 2 : i32
    %8 = arith.addi %0, %c2_i32 : i32
    %9 = arith.index_cast %8 : i32 to index
    %10 = memref.load %arg1[%9] : memref<8xi32, #tpu.memory_space<smem>>
    %c3_i32 = arith.constant 3 : i32
    %11 = arith.addi %0, %c3_i32 : i32
    %12 = arith.index_cast %11 : i32 to index
    %13 = memref.load %arg1[%12] : memref<8xi32, #tpu.memory_space<smem>>
    %c4_i32 = arith.constant 4 : i32
    %14 = arith.addi %0, %c4_i32 : i32
    %15 = arith.index_cast %14 : i32 to index
    %16 = memref.load %arg1[%15] : memref<8xi32, #tpu.memory_space<smem>>
    %c5_i32 = arith.constant 5 : i32
    %17 = arith.addi %0, %c5_i32 : i32
    %18 = arith.index_cast %17 : i32 to index
    %19 = memref.load %arg1[%18] : memref<8xi32, #tpu.memory_space<smem>>
    %c6_i32 = arith.constant 6 : i32
    %20 = arith.addi %0, %c6_i32 : i32
    %21 = arith.index_cast %20 : i32 to index
    %22 = memref.load %arg1[%21] : memref<8xi32, #tpu.memory_space<smem>>
    %c7_i32 = arith.constant 7 : i32
    %23 = arith.addi %0, %c7_i32 : i32
    %24 = arith.index_cast %23 : i32 to index
    %25 = memref.load %arg1[%24] : memref<8xi32, #tpu.memory_space<smem>>
    %c1_i32_1 = arith.constant 1 : i32
    %c0_i32_2 = arith.constant 0 : i32
    %c0_i32_3 = arith.constant 0 : i32
    %c0_i32_4 = arith.constant 0 : i32
    %26 = tpu.memref_slice %arg2[%4, %c1_i32_1, %c0_i32_4] : memref<8x2x768xf32, #tpu.memory_space<any>> -> memref<1x1x768xf32, #tpu.memory_space<any>>
    %27 = tpu.memref_squeeze %26 : memref<1x1x768xf32, #tpu.memory_space<any>> -> memref<768xf32, #tpu.memory_space<any>>
    %c0_i32_5 = arith.constant 0 : i32
    %28 = tpu.memref_slice %arg3[%c0_i32_2, %c0_i32_5] : memref<8x768xf32, #tpu.memory_space<vmem>> -> memref<1x768xf32, #tpu.memory_space<vmem>>
    %29 = tpu.memref_squeeze %28 : memref<1x768xf32, #tpu.memory_space<vmem>> -> memref<768xf32, #tpu.memory_space<vmem>>
    %30 = tpu.memref_slice %arg4[%c0_i32_3] : memref<8x!tpu.dma_semaphore, #tpu.memory_space<semaphore_mem>> -> memref<1x!tpu.dma_semaphore, #tpu.memory_space<semaphore_mem>>
    %31 = tpu.memref_squeeze %30 : memref<1x!tpu.dma_semaphore, #tpu.memory_space<semaphore_mem>> -> memref<!tpu.dma_semaphore, #tpu.memory_space<semaphore_mem>>
    tpu.enqueue_dma source(%27 : memref<768xf32, #tpu.memory_space<any>>) target(%29 : memref<768xf32, #tpu.memory_space<vmem>>) target_semaphore(%31 : memref<!tpu.dma_semaphore, #tpu.memory_space<semaphore_mem>>)
    %c1_i32_6 = arith.constant 1 : i32
    %c1_i32_7 = arith.constant 1 : i32
    %c1_i32_8 = arith.constant 1 : i32
    %c0_i32_9 = arith.constant 0 : i32
    %32 = tpu.memref_slice %arg2[%7, %c1_i32_6, %c0_i32_9] : memref<8x2x768xf32, #tpu.memory_space<any>> -> memref<1x1x768xf32, #tpu.memory_space<any>>
    %33 = tpu.memref_squeeze %32 : memref<1x1x768xf32, #tpu.memory_space<any>> -> memref<768xf32, #tpu.memory_space<any>>
    %c0_i32_10 = arith.constant 0 : i32
    %34 = tpu.memref_slice %arg3[%c1_i32_7, %c0_i32_10] : memref<8x768xf32, #tpu.memory_space<vmem>> -> memref<1x768xf32, #tpu.memory_space<vmem>>
    %35 = tpu.memref_squeeze %34 : memref<1x768xf32, #tpu.memory_space<vmem>> -> memref<768xf32, #tpu.memory_space<vmem>>
    %36 = tpu.memref_slice %arg4[%c1_i32_8] : memref<8x!tpu.dma_semaphore, #tpu.memory_space<semaphore_mem>> -> memref<1x!tpu.dma_semaphore, #tpu.memory_space<semaphore_mem>>
    %37 = tpu.memref_squeeze %36 : memref<1x!tpu.dma_semaphore, #tpu.memory_space<semaphore_mem>> -> memref<!tpu.dma_semaphore, #tpu.memory_space<semaphore_mem>>
    tpu.enqueue_dma source(%33 : memref<768xf32, #tpu.memory_space<any>>) target(%35 : memref<768xf32, #tpu.memory_space<vmem>>) target_semaphore(%37 : memref<!tpu.dma_semaphore, #tpu.memory_space<semaphore_mem>>)
    %38 = arith.extui %1 : i1 to i32
    %c1_i32_11 = arith.constant 1 : i32
    %c2_i32_12 = arith.constant 2 : i32
    %c2_i32_13 = arith.constant 2 : i32
    %c1_i32_14 = arith.constant 1 : i32
    %c3_i32_15 = arith.constant 3 : i32
    %c3_i32_16 = arith.constant 3 : i32
    %c1_i32_17 = arith.constant 1 : i32
    %c4_i32_18 = arith.constant 4 : i32
    %c4_i32_19 = arith.constant 4 : i32
    %c1_i32_20 = arith.constant 1 : i32
    %c5_i32_21 = arith.constant 5 : i32
    %c5_i32_22 = arith.constant 5 : i32
    %c1_i32_23 = arith.constant 1 : i32
    %c6_i32_24 = arith.constant 6 : i32
    %c6_i32_25 = arith.constant 6 : i32
    %c1_i32_26 = arith.constant 1 : i32
    %c7_i32_27 = arith.constant 7 : i32
    %c7_i32_28 = arith.constant 7 : i32
    %c0_i32_29 = arith.constant 0 : i32
    %39 = arith.cmpi ne, %38, %c0_i32_29 : i32
    scf.if %39 {
      %c0_i32_59 = arith.constant 0 : i32
      %54 = tpu.memref_slice %arg2[%10, %c1_i32_11, %c0_i32_59] : memref<8x2x768xf32, #tpu.memory_space<any>> -> memref<1x1x768xf32, #tpu.memory_space<any>>
      %55 = tpu.memref_squeeze %54 : memref<1x1x768xf32, #tpu.memory_space<any>> -> memref<768xf32, #tpu.memory_space<any>>
      %c0_i32_60 = arith.constant 0 : i32
      %56 = tpu.memref_slice %arg3[%c2_i32_12, %c0_i32_60] : memref<8x768xf32, #tpu.memory_space<vmem>> -> memref<1x768xf32, #tpu.memory_space<vmem>>
      %57 = tpu.memref_squeeze %56 : memref<1x768xf32, #tpu.memory_space<vmem>> -> memref<768xf32, #tpu.memory_space<vmem>>
      %58 = tpu.memref_slice %arg4[%c2_i32_13] : memref<8x!tpu.dma_semaphore, #tpu.memory_space<semaphore_mem>> -> memref<1x!tpu.dma_semaphore, #tpu.memory_space<semaphore_mem>>
      %59 = tpu.memref_squeeze %58 : memref<1x!tpu.dma_semaphore, #tpu.memory_space<semaphore_mem>> -> memref<!tpu.dma_semaphore, #tpu.memory_space<semaphore_mem>>
      tpu.enqueue_dma source(%55 : memref<768xf32, #tpu.memory_space<any>>) target(%57 : memref<768xf32, #tpu.memory_space<vmem>>) target_semaphore(%59 : memref<!tpu.dma_semaphore, #tpu.memory_space<semaphore_mem>>)
      %c0_i32_61 = arith.constant 0 : i32
      %60 = tpu.memref_slice %arg2[%13, %c1_i32_14, %c0_i32_61] : memref<8x2x768xf32, #tpu.memory_space<any>> -> memref<1x1x768xf32, #tpu.memory_space<any>>
      %61 = tpu.memref_squeeze %60 : memref<1x1x768xf32, #tpu.memory_space<any>> -> memref<768xf32, #tpu.memory_space<any>>
      %c0_i32_62 = arith.constant 0 : i32
      %62 = tpu.memref_slice %arg3[%c3_i32_15, %c0_i32_62] : memref<8x768xf32, #tpu.memory_space<vmem>> -> memref<1x768xf32, #tpu.memory_space<vmem>>
      %63 = tpu.memref_squeeze %62 : memref<1x768xf32, #tpu.memory_space<vmem>> -> memref<768xf32, #tpu.memory_space<vmem>>
      %64 = tpu.memref_slice %arg4[%c3_i32_16] : memref<8x!tpu.dma_semaphore, #tpu.memory_space<semaphore_mem>> -> memref<1x!tpu.dma_semaphore, #tpu.memory_space<semaphore_mem>>
      %65 = tpu.memref_squeeze %64 : memref<1x!tpu.dma_semaphore, #tpu.memory_space<semaphore_mem>> -> memref<!tpu.dma_semaphore, #tpu.memory_space<semaphore_mem>>
      tpu.enqueue_dma source(%61 : memref<768xf32, #tpu.memory_space<any>>) target(%63 : memref<768xf32, #tpu.memory_space<vmem>>) target_semaphore(%65 : memref<!tpu.dma_semaphore, #tpu.memory_space<semaphore_mem>>)
      %c0_i32_63 = arith.constant 0 : i32
      %66 = tpu.memref_slice %arg2[%16, %c1_i32_17, %c0_i32_63] : memref<8x2x768xf32, #tpu.memory_space<any>> -> memref<1x1x768xf32, #tpu.memory_space<any>>
      %67 = tpu.memref_squeeze %66 : memref<1x1x768xf32, #tpu.memory_space<any>> -> memref<768xf32, #tpu.memory_space<any>>
      %c0_i32_64 = arith.constant 0 : i32
      %68 = tpu.memref_slice %arg3[%c4_i32_18, %c0_i32_64] : memref<8x768xf32, #tpu.memory_space<vmem>> -> memref<1x768xf32, #tpu.memory_space<vmem>>
      %69 = tpu.memref_squeeze %68 : memref<1x768xf32, #tpu.memory_space<vmem>> -> memref<768xf32, #tpu.memory_space<vmem>>
      %70 = tpu.memref_slice %arg4[%c4_i32_19] : memref<8x!tpu.dma_semaphore, #tpu.memory_space<semaphore_mem>> -> memref<1x!tpu.dma_semaphore, #tpu.memory_space<semaphore_mem>>
      %71 = tpu.memref_squeeze %70 : memref<1x!tpu.dma_semaphore, #tpu.memory_space<semaphore_mem>> -> memref<!tpu.dma_semaphore, #tpu.memory_space<semaphore_mem>>
      tpu.enqueue_dma source(%67 : memref<768xf32, #tpu.memory_space<any>>) target(%69 : memref<768xf32, #tpu.memory_space<vmem>>) target_semaphore(%71 : memref<!tpu.dma_semaphore, #tpu.memory_space<semaphore_mem>>)
      %c0_i32_65 = arith.constant 0 : i32
      %72 = tpu.memref_slice %arg2[%19, %c1_i32_20, %c0_i32_65] : memref<8x2x768xf32, #tpu.memory_space<any>> -> memref<1x1x768xf32, #tpu.memory_space<any>>
      %73 = tpu.memref_squeeze %72 : memref<1x1x768xf32, #tpu.memory_space<any>> -> memref<768xf32, #tpu.memory_space<any>>
      %c0_i32_66 = arith.constant 0 : i32
      %74 = tpu.memref_slice %arg3[%c5_i32_21, %c0_i32_66] : memref<8x768xf32, #tpu.memory_space<vmem>> -> memref<1x768xf32, #tpu.memory_space<vmem>>
      %75 = tpu.memref_squeeze %74 : memref<1x768xf32, #tpu.memory_space<vmem>> -> memref<768xf32, #tpu.memory_space<vmem>>
      %76 = tpu.memref_slice %arg4[%c5_i32_22] : memref<8x!tpu.dma_semaphore, #tpu.memory_space<semaphore_mem>> -> memref<1x!tpu.dma_semaphore, #tpu.memory_space<semaphore_mem>>
      %77 = tpu.memref_squeeze %76 : memref<1x!tpu.dma_semaphore, #tpu.memory_space<semaphore_mem>> -> memref<!tpu.dma_semaphore, #tpu.memory_space<semaphore_mem>>
      tpu.enqueue_dma source(%73 : memref<768xf32, #tpu.memory_space<any>>) target(%75 : memref<768xf32, #tpu.memory_space<vmem>>) target_semaphore(%77 : memref<!tpu.dma_semaphore, #tpu.memory_space<semaphore_mem>>)
      %c0_i32_67 = arith.constant 0 : i32
      %78 = tpu.memref_slice %arg2[%22, %c1_i32_23, %c0_i32_67] : memref<8x2x768xf32, #tpu.memory_space<any>> -> memref<1x1x768xf32, #tpu.memory_space<any>>
      %79 = tpu.memref_squeeze %78 : memref<1x1x768xf32, #tpu.memory_space<any>> -> memref<768xf32, #tpu.memory_space<any>>
      %c0_i32_68 = arith.constant 0 : i32
      %80 = tpu.memref_slice %arg3[%c6_i32_24, %c0_i32_68] : memref<8x768xf32, #tpu.memory_space<vmem>> -> memref<1x768xf32, #tpu.memory_space<vmem>>
      %81 = tpu.memref_squeeze %80 : memref<1x768xf32, #tpu.memory_space<vmem>> -> memref<768xf32, #tpu.memory_space<vmem>>
      %82 = tpu.memref_slice %arg4[%c6_i32_25] : memref<8x!tpu.dma_semaphore, #tpu.memory_space<semaphore_mem>> -> memref<1x!tpu.dma_semaphore, #tpu.memory_space<semaphore_mem>>
      %83 = tpu.memref_squeeze %82 : memref<1x!tpu.dma_semaphore, #tpu.memory_space<semaphore_mem>> -> memref<!tpu.dma_semaphore, #tpu.memory_space<semaphore_mem>>
      tpu.enqueue_dma source(%79 : memref<768xf32, #tpu.memory_space<any>>) target(%81 : memref<768xf32, #tpu.memory_space<vmem>>) target_semaphore(%83 : memref<!tpu.dma_semaphore, #tpu.memory_space<semaphore_mem>>)
      %c0_i32_69 = arith.constant 0 : i32
      %84 = tpu.memref_slice %arg2[%25, %c1_i32_26, %c0_i32_69] : memref<8x2x768xf32, #tpu.memory_space<any>> -> memref<1x1x768xf32, #tpu.memory_space<any>>
      %85 = tpu.memref_squeeze %84 : memref<1x1x768xf32, #tpu.memory_space<any>> -> memref<768xf32, #tpu.memory_space<any>>
      %c0_i32_70 = arith.constant 0 : i32
      %86 = tpu.memref_slice %arg3[%c7_i32_27, %c0_i32_70] : memref<8x768xf32, #tpu.memory_space<vmem>> -> memref<1x768xf32, #tpu.memory_space<vmem>>
      %87 = tpu.memref_squeeze %86 : memref<1x768xf32, #tpu.memory_space<vmem>> -> memref<768xf32, #tpu.memory_space<vmem>>
      %88 = tpu.memref_slice %arg4[%c7_i32_28] : memref<8x!tpu.dma_semaphore, #tpu.memory_space<semaphore_mem>> -> memref<1x!tpu.dma_semaphore, #tpu.memory_space<semaphore_mem>>
      %89 = tpu.memref_squeeze %88 : memref<1x!tpu.dma_semaphore, #tpu.memory_space<semaphore_mem>> -> memref<!tpu.dma_semaphore, #tpu.memory_space<semaphore_mem>>
      tpu.enqueue_dma source(%85 : memref<768xf32, #tpu.memory_space<any>>) target(%87 : memref<768xf32, #tpu.memory_space<vmem>>) target_semaphore(%89 : memref<!tpu.dma_semaphore, #tpu.memory_space<semaphore_mem>>)
    } else {
    }
    %c1_i32_30 = arith.constant 1 : i32
    %c0_i32_31 = arith.constant 0 : i32
    %c0_i32_32 = arith.constant 0 : i32
    %c0_i32_33 = arith.constant 0 : i32
    %40 = tpu.memref_slice %arg2[%4, %c1_i32_30, %c0_i32_33] : memref<8x2x768xf32, #tpu.memory_space<any>> -> memref<1x1x768xf32, #tpu.memory_space<any>>
    %41 = tpu.memref_squeeze %40 : memref<1x1x768xf32, #tpu.memory_space<any>> -> memref<768xf32, #tpu.memory_space<any>>
    %c0_i32_34 = arith.constant 0 : i32
    %42 = tpu.memref_slice %arg3[%c0_i32_31, %c0_i32_34] : memref<8x768xf32, #tpu.memory_space<vmem>> -> memref<1x768xf32, #tpu.memory_space<vmem>>
    %43 = tpu.memref_squeeze %42 : memref<1x768xf32, #tpu.memory_space<vmem>> -> memref<768xf32, #tpu.memory_space<vmem>>
    %44 = tpu.memref_slice %arg4[%c0_i32_32] : memref<8x!tpu.dma_semaphore, #tpu.memory_space<semaphore_mem>> -> memref<1x!tpu.dma_semaphore, #tpu.memory_space<semaphore_mem>>
    %45 = tpu.memref_squeeze %44 : memref<1x!tpu.dma_semaphore, #tpu.memory_space<semaphore_mem>> -> memref<!tpu.dma_semaphore, #tpu.memory_space<semaphore_mem>>
    tpu.wait_dma2 semaphore(%45 : memref<!tpu.dma_semaphore, #tpu.memory_space<semaphore_mem>>) src(%41 : memref<768xf32, #tpu.memory_space<any>>) dst(%43 : memref<768xf32, #tpu.memory_space<vmem>>)
    %c1_i32_35 = arith.constant 1 : i32
    %c1_i32_36 = arith.constant 1 : i32
    %c1_i32_37 = arith.constant 1 : i32
    %c0_i32_38 = arith.constant 0 : i32
    %46 = tpu.memref_slice %arg2[%7, %c1_i32_35, %c0_i32_38] : memref<8x2x768xf32, #tpu.memory_space<any>> -> memref<1x1x768xf32, #tpu.memory_space<any>>
    %47 = tpu.memref_squeeze %46 : memref<1x1x768xf32, #tpu.memory_space<any>> -> memref<768xf32, #tpu.memory_space<any>>
    %c0_i32_39 = arith.constant 0 : i32
    %48 = tpu.memref_slice %arg3[%c1_i32_36, %c0_i32_39] : memref<8x768xf32, #tpu.memory_space<vmem>> -> memref<1x768xf32, #tpu.memory_space<vmem>>
    %49 = tpu.memref_squeeze %48 : memref<1x768xf32, #tpu.memory_space<vmem>> -> memref<768xf32, #tpu.memory_space<vmem>>
    %50 = tpu.memref_slice %arg4[%c1_i32_37] : memref<8x!tpu.dma_semaphore, #tpu.memory_space<semaphore_mem>> -> memref<1x!tpu.dma_semaphore, #tpu.memory_space<semaphore_mem>>
    %51 = tpu.memref_squeeze %50 : memref<1x!tpu.dma_semaphore, #tpu.memory_space<semaphore_mem>> -> memref<!tpu.dma_semaphore, #tpu.memory_space<semaphore_mem>>
    tpu.wait_dma2 semaphore(%51 : memref<!tpu.dma_semaphore, #tpu.memory_space<semaphore_mem>>) src(%47 : memref<768xf32, #tpu.memory_space<any>>) dst(%49 : memref<768xf32, #tpu.memory_space<vmem>>)
    %52 = arith.extui %1 : i1 to i32
    %c1_i32_40 = arith.constant 1 : i32
    %c2_i32_41 = arith.constant 2 : i32
    %c2_i32_42 = arith.constant 2 : i32
    %c1_i32_43 = arith.constant 1 : i32
    %c3_i32_44 = arith.constant 3 : i32
    %c3_i32_45 = arith.constant 3 : i32
    %c1_i32_46 = arith.constant 1 : i32
    %c4_i32_47 = arith.constant 4 : i32
    %c4_i32_48 = arith.constant 4 : i32
    %c1_i32_49 = arith.constant 1 : i32
    %c5_i32_50 = arith.constant 5 : i32
    %c5_i32_51 = arith.constant 5 : i32
    %c1_i32_52 = arith.constant 1 : i32
    %c6_i32_53 = arith.constant 6 : i32
    %c6_i32_54 = arith.constant 6 : i32
    %c1_i32_55 = arith.constant 1 : i32
    %c7_i32_56 = arith.constant 7 : i32
    %c7_i32_57 = arith.constant 7 : i32
    %c0_i32_58 = arith.constant 0 : i32
    %53 = arith.cmpi ne, %52, %c0_i32_58 : i32
    scf.if %53 {
      %c0_i32_59 = arith.constant 0 : i32
      %54 = tpu.memref_slice %arg2[%10, %c1_i32_40, %c0_i32_59] : memref<8x2x768xf32, #tpu.memory_space<any>> -> memref<1x1x768xf32, #tpu.memory_space<any>>
      %55 = tpu.memref_squeeze %54 : memref<1x1x768xf32, #tpu.memory_space<any>> -> memref<768xf32, #tpu.memory_space<any>>
      %c0_i32_60 = arith.constant 0 : i32
      %56 = tpu.memref_slice %arg3[%c2_i32_41, %c0_i32_60] : memref<8x768xf32, #tpu.memory_space<vmem>> -> memref<1x768xf32, #tpu.memory_space<vmem>>
      %57 = tpu.memref_squeeze %56 : memref<1x768xf32, #tpu.memory_space<vmem>> -> memref<768xf32, #tpu.memory_space<vmem>>
      %58 = tpu.memref_slice %arg4[%c2_i32_42] : memref<8x!tpu.dma_semaphore, #tpu.memory_space<semaphore_mem>> -> memref<1x!tpu.dma_semaphore, #tpu.memory_space<semaphore_mem>>
      %59 = tpu.memref_squeeze %58 : memref<1x!tpu.dma_semaphore, #tpu.memory_space<semaphore_mem>> -> memref<!tpu.dma_semaphore, #tpu.memory_space<semaphore_mem>>
      tpu.wait_dma2 semaphore(%59 : memref<!tpu.dma_semaphore, #tpu.memory_space<semaphore_mem>>) src(%55 : memref<768xf32, #tpu.memory_space<any>>) dst(%57 : memref<768xf32, #tpu.memory_space<vmem>>)
      %c0_i32_61 = arith.constant 0 : i32
      %60 = tpu.memref_slice %arg2[%13, %c1_i32_43, %c0_i32_61] : memref<8x2x768xf32, #tpu.memory_space<any>> -> memref<1x1x768xf32, #tpu.memory_space<any>>
      %61 = tpu.memref_squeeze %60 : memref<1x1x768xf32, #tpu.memory_space<any>> -> memref<768xf32, #tpu.memory_space<any>>
      %c0_i32_62 = arith.constant 0 : i32
      %62 = tpu.memref_slice %arg3[%c3_i32_44, %c0_i32_62] : memref<8x768xf32, #tpu.memory_space<vmem>> -> memref<1x768xf32, #tpu.memory_space<vmem>>
      %63 = tpu.memref_squeeze %62 : memref<1x768xf32, #tpu.memory_space<vmem>> -> memref<768xf32, #tpu.memory_space<vmem>>
      %64 = tpu.memref_slice %arg4[%c3_i32_45] : memref<8x!tpu.dma_semaphore, #tpu.memory_space<semaphore_mem>> -> memref<1x!tpu.dma_semaphore, #tpu.memory_space<semaphore_mem>>
      %65 = tpu.memref_squeeze %64 : memref<1x!tpu.dma_semaphore, #tpu.memory_space<semaphore_mem>> -> memref<!tpu.dma_semaphore, #tpu.memory_space<semaphore_mem>>
      tpu.wait_dma2 semaphore(%65 : memref<!tpu.dma_semaphore, #tpu.memory_space<semaphore_mem>>) src(%61 : memref<768xf32, #tpu.memory_space<any>>) dst(%63 : memref<768xf32, #tpu.memory_space<vmem>>)
      %c0_i32_63 = arith.constant 0 : i32
      %66 = tpu.memref_slice %arg2[%16, %c1_i32_46, %c0_i32_63] : memref<8x2x768xf32, #tpu.memory_space<any>> -> memref<1x1x768xf32, #tpu.memory_space<any>>
      %67 = tpu.memref_squeeze %66 : memref<1x1x768xf32, #tpu.memory_space<any>> -> memref<768xf32, #tpu.memory_space<any>>
      %c0_i32_64 = arith.constant 0 : i32
      %68 = tpu.memref_slice %arg3[%c4_i32_47, %c0_i32_64] : memref<8x768xf32, #tpu.memory_space<vmem>> -> memref<1x768xf32, #tpu.memory_space<vmem>>
      %69 = tpu.memref_squeeze %68 : memref<1x768xf32, #tpu.memory_space<vmem>> -> memref<768xf32, #tpu.memory_space<vmem>>
      %70 = tpu.memref_slice %arg4[%c4_i32_48] : memref<8x!tpu.dma_semaphore, #tpu.memory_space<semaphore_mem>> -> memref<1x!tpu.dma_semaphore, #tpu.memory_space<semaphore_mem>>
      %71 = tpu.memref_squeeze %70 : memref<1x!tpu.dma_semaphore, #tpu.memory_space<semaphore_mem>> -> memref<!tpu.dma_semaphore, #tpu.memory_space<semaphore_mem>>
      tpu.wait_dma2 semaphore(%71 : memref<!tpu.dma_semaphore, #tpu.memory_space<semaphore_mem>>) src(%67 : memref<768xf32, #tpu.memory_space<any>>) dst(%69 : memref<768xf32, #tpu.memory_space<vmem>>)
      %c0_i32_65 = arith.constant 0 : i32
      %72 = tpu.memref_slice %arg2[%19, %c1_i32_49, %c0_i32_65] : memref<8x2x768xf32, #tpu.memory_space<any>> -> memref<1x1x768xf32, #tpu.memory_space<any>>
      %73 = tpu.memref_squeeze %72 : memref<1x1x768xf32, #tpu.memory_space<any>> -> memref<768xf32, #tpu.memory_space<any>>
      %c0_i32_66 = arith.constant 0 : i32
      %74 = tpu.memref_slice %arg3[%c5_i32_50, %c0_i32_66] : memref<8x768xf32, #tpu.memory_space<vmem>> -> memref<1x768xf32, #tpu.memory_space<vmem>>
      %75 = tpu.memref_squeeze %74 : memref<1x768xf32, #tpu.memory_space<vmem>> -> memref<768xf32, #tpu.memory_space<vmem>>
      %76 = tpu.memref_slice %arg4[%c5_i32_51] : memref<8x!tpu.dma_semaphore, #tpu.memory_space<semaphore_mem>> -> memref<1x!tpu.dma_semaphore, #tpu.memory_space<semaphore_mem>>
      %77 = tpu.memref_squeeze %76 : memref<1x!tpu.dma_semaphore, #tpu.memory_space<semaphore_mem>> -> memref<!tpu.dma_semaphore, #tpu.memory_space<semaphore_mem>>
      tpu.wait_dma2 semaphore(%77 : memref<!tpu.dma_semaphore, #tpu.memory_space<semaphore_mem>>) src(%73 : memref<768xf32, #tpu.memory_space<any>>) dst(%75 : memref<768xf32, #tpu.memory_space<vmem>>)
      %c0_i32_67 = arith.constant 0 : i32
      %78 = tpu.memref_slice %arg2[%22, %c1_i32_52, %c0_i32_67] : memref<8x2x768xf32, #tpu.memory_space<any>> -> memref<1x1x768xf32, #tpu.memory_space<any>>
      %79 = tpu.memref_squeeze %78 : memref<1x1x768xf32, #tpu.memory_space<any>> -> memref<768xf32, #tpu.memory_space<any>>
      %c0_i32_68 = arith.constant 0 : i32
      %80 = tpu.memref_slice %arg3[%c6_i32_53, %c0_i32_68] : memref<8x768xf32, #tpu.memory_space<vmem>> -> memref<1x768xf32, #tpu.memory_space<vmem>>
      %81 = tpu.memref_squeeze %80 : memref<1x768xf32, #tpu.memory_space<vmem>> -> memref<768xf32, #tpu.memory_space<vmem>>
      %82 = tpu.memref_slice %arg4[%c6_i32_54] : memref<8x!tpu.dma_semaphore, #tpu.memory_space<semaphore_mem>> -> memref<1x!tpu.dma_semaphore, #tpu.memory_space<semaphore_mem>>
      %83 = tpu.memref_squeeze %82 : memref<1x!tpu.dma_semaphore, #tpu.memory_space<semaphore_mem>> -> memref<!tpu.dma_semaphore, #tpu.memory_space<semaphore_mem>>
      tpu.wait_dma2 semaphore(%83 : memref<!tpu.dma_semaphore, #tpu.memory_space<semaphore_mem>>) src(%79 : memref<768xf32, #tpu.memory_space<any>>) dst(%81 : memref<768xf32, #tpu.memory_space<vmem>>)
      %c0_i32_69 = arith.constant 0 : i32
      %84 = tpu.memref_slice %arg2[%25, %c1_i32_55, %c0_i32_69] : memref<8x2x768xf32, #tpu.memory_space<any>> -> memref<1x1x768xf32, #tpu.memory_space<any>>
      %85 = tpu.memref_squeeze %84 : memref<1x1x768xf32, #tpu.memory_space<any>> -> memref<768xf32, #tpu.memory_space<any>>
      %c0_i32_70 = arith.constant 0 : i32
      %86 = tpu.memref_slice %arg3[%c7_i32_56, %c0_i32_70] : memref<8x768xf32, #tpu.memory_space<vmem>> -> memref<1x768xf32, #tpu.memory_space<vmem>>
      %87 = tpu.memref_squeeze %86 : memref<1x768xf32, #tpu.memory_space<vmem>> -> memref<768xf32, #tpu.memory_space<vmem>>
      %88 = tpu.memref_slice %arg4[%c7_i32_57] : memref<8x!tpu.dma_semaphore, #tpu.memory_space<semaphore_mem>> -> memref<1x!tpu.dma_semaphore, #tpu.memory_space<semaphore_mem>>
      %89 = tpu.memref_squeeze %88 : memref<1x!tpu.dma_semaphore, #tpu.memory_space<semaphore_mem>> -> memref<!tpu.dma_semaphore, #tpu.memory_space<semaphore_mem>>
      tpu.wait_dma2 semaphore(%89 : memref<!tpu.dma_semaphore, #tpu.memory_space<semaphore_mem>>) src(%85 : memref<768xf32, #tpu.memory_space<any>>) dst(%87 : memref<768xf32, #tpu.memory_space<vmem>>)
    } else {
    }
    return
  }
  func.func @transform_1(%arg0: i32, %arg1: memref<8xi32, #tpu.memory_space<smem>>) -> (i32, i32) {
    %c0_i32 = arith.constant 0 : i32
    %c0_i32_0 = arith.constant 0 : i32
    return %arg0, %c0_i32 : i32, i32
  }
}

</mosaic_0001>

<bundles_post_ra>
// kernel: tpu_custom_call.1
= control target key start
LH: loop header
LB: loop body
LE: loop exit
PB: predicated region body
PF: predicated region fallthrough
CT: control target
= control target key end

     0   :  { %s355_s9 = smov [#allocation4]   ;;  %s430_s0 = inlined_call_operand.hbm [shape: s32[8], index: 0, kind: input, shape index: {}]   ;;  %s431_s1 = inlined_call_operand.hbm [shape: f32[8,2,768], index: 1, kind: input, shape index: {}]   ;;  %s432_s2 = inlined_call_operand.hbm [shape: f32[8,768], index: 2, kind: output, shape index: {}]  }
   0x1   :  { %8 = dma.hbm_to_smem %s430_s0, 16, %s355_s9, [#allocation3] }
   0x2   :  { %347 = dma.done.wait [#allocation3], 16 }
   0x3   :  { %348 = vsyncadd [#allocation3], 4294967280 }
   0x4   :  { %10 = sfence }
   0x5   :  { %11 = vsyncpa [#allocation6], 0  ;;  %s14_s12 = sld [smem:[#allocation4]]  ;;  %s356_s13 = smov [#allocation5]  }
   0x6   :  { %s34_s14 = sshll.u32 %s356_s13, 4  ;;  %s379_s15 = sld [smem:[#allocation4 + $0x1]]  ;;  %s381_s14 = int_to_ptr.vmem [resolvable:$true] %s34_s14 }
   0x7   :  { %s357_s16 = smov [#allocation5 + $0x1]   ;;  %s283_s26 = scalar_lea.hbm %s431_s1, 1536 }
   0x8   :  { %s45_s17 = sshll.u32 %s357_s16, 4  ;;  %s386_s17 = int_to_ptr.vmem [resolvable:$true] %s45_s17 }
   0xb   :  { %s251_s18 = smul.u32 192, %s14_s12 }
   0xc   :  { %s252_s22 = smul.u32 192, %s379_s15 }
   0xd   :  { %s214_s21 = scalar_lea.hbm %s431_s1, %s251_s18 }
   0xe   :  { %s215_s0 = scalar_lea.hbm %s214_s21, 16  ;;  %s303_s23 = scalar_lea.hbm %s214_s21, 112 }
   0xf   :  { %p282_p0 = scmp.ne.s32.totalorder %s215_s0, %s303_s23  ;;  %p284_p1 = scmp.lt.s32.totalorder %s215_s0, %s431_s1 }
  0x10   :  { %p285_p2 = scmp.lt.s32.totalorder %s283_s26, %s303_s23 }
  0x12   :  { %p286_p3 = por %p285_p2, %p284_p1 }
  0x14   :  { %p287_p4 = pnand %p286_p3, %p282_p0 }
  0x16   :  { %290 = shalt.err (!%p287_p4)  }
  0x17   :  { %s291_s29 = scalar_lea.vmem %s381_s14, 96  ;;  %s398_s30 = scalar_lea.vmem %s381_s14, 768 }
  0x18   :  { %p292_p5 = scmp.ne.s32.totalorder %s381_s14, %s291_s29  ;;  %p296_p6 = scmp.lt.s32.totalorder %s381_s14, %s381_s14 }
  0x19   :  { %p297_p7 = scmp.lt.s32.totalorder %s398_s30, %s291_s29 }
  0x1b   :  { %p298_p8 = por %p297_p7, %p296_p6 }
  0x1d   :  { %p299_p9 = pnand %p298_p8, %p292_p5 }
  0x1f   :  { %302 = shalt.err (!%p299_p9)  }
  0x20   :  { %s358_s3 = smov 32   ;;  %s359_s4 = smov 128  }
  0x21   :  { %s360_s5 = smov 1   ;;  %s218_s8 = scalar_lea.hbm %s431_s1, %s252_s22 }
  0x22   :  { %37 = dma.hbm_to_vmem [thread:$0]  %s215_s0, 96, %s381_s14, [#allocation2], %s358_s3, %s359_s4, %s360_s5 }
  0x23   :  { %s219_s9 = scalar_lea.hbm %s218_s8, 16  ;;  %s326_s10 = scalar_lea.hbm %s218_s8, 112 }
  0x24   :  { %p305_p10 = scmp.ne.s32.totalorder %s219_s9, %s326_s10  ;;  %p307_p11 = scmp.lt.s32.totalorder %s219_s9, %s431_s1 }
  0x25   :  { %p308_p12 = scmp.lt.s32.totalorder %s283_s26, %s326_s10 }
  0x27   :  { %p309_p13 = por %p308_p12, %p307_p11 }
  0x29   :  { %p310_p0 = pnand %p309_p13, %p305_p10 }
  0x2b   :  { %313 = shalt.err (!%p310_p0)  }
  0x2c   :  { %s314_s13 = scalar_lea.vmem %s386_s17, 96  ;;  %p319_p2 = scmp.lt.s32.totalorder %s386_s17, %s381_s14 }
  0x2d   :  { %p315_p1 = scmp.ne.s32.totalorder %s386_s17, %s314_s13  ;;  %p320_p3 = scmp.lt.s32.totalorder %s398_s30, %s314_s13 }
  0x2f   :  { %p321_p4 = por %p320_p3, %p319_p2 }
  0x31   :  { %p322_p5 = pnand %p321_p4, %p315_p1 }
  0x33   :  { %325 = shalt.err (!%p322_p5)  }
  0x34   :  { %48 = dma.hbm_to_vmem [thread:$0]  %s219_s9, 96, %s386_s17, [#allocation2 + $0x1], %s358_s3, %s359_s4, %s360_s5 }
  0x35   :  { %349 = dma.done.wait [#allocation2], 96 }
  0x36   :  { %350 = vsyncadd [#allocation2], 4294967200 }
  0x37   :  { %351 = dma.done.wait [#allocation2 + $0x1], 96 }
  0x38   :  { %352 = vsyncadd [#allocation2 + $0x1], 4294967200  ;;  %p328_p7 = scmp.ne.s32.totalorder %s381_s14, %s398_s30  ;;  %p333_p8 = scmp.lt.s32.totalorder %s398_s30, %s398_s30 }
  0x3a   :  { %p334_p9 = por %p333_p8, %p296_p6 }
  0x3c   :  { %p335_p10 = pnand %p334_p9, %p328_p7 }
  0x3e   :  { %338 = shalt.err (!%p335_p10)
}
  0x3f   :  { %152 = dma.vmem_to_hbm [thread:$0]  %s381_s14, 768, %s432_s2, [#allocation6]  }
  0x40   :  { %353 = dma.done.wait [#allocation6], 768  }
  0x41   :  { %354 = vsyncadd [#allocation6], 4294966528 }
  0x42   :  { %156 = vsyncpa [#allocation6], 1 }
  0x43   :  { %157 = vsyncmov [#allocation2] }
  0x46   :  { %s158_s16 = vpop.sfrf %157 }
  0x47   :  { %p259_p11 = scmp.ne.s32.totalorder %s158_s16, 0 }
  0x49   :  { %162 = shalt.err (%p259_p11)  }
  0x4a   :  { %164 = vsyncmov [#allocation2 + $0x1] }
  0x4d   :  { %s165_s17 = vpop.sfrf %164 }
  0x4e   :  { %p260_p12 = scmp.ne.s32.totalorder %s165_s17, 0 }
  0x50   :  { %169 = shalt.err (%p260_p12)  }
  0x51   :  { %171 = vsyncmov [#allocation2 + $0x2] }
  0x54   :  { %s172_s18 = vpop.sfrf %171 }
  0x55   :  { %p261_p6 = scmp.ne.s32.totalorder %s172_s18, 0 }
  0x57   :  { %176 = shalt.err (%p261_p6)  }
  0x58   :  { %178 = vsyncmov [#allocation2 + $0x3] }
  0x5b   :  { %s179_s19 = vpop.sfrf %178 }
  0x5c   :  { %p262_p13 = scmp.ne.s32.totalorder %s179_s19, 0 }
  0x5e   :  { %183 = shalt.err (%p262_p13)  }
  0x5f   :  { %185 = vsyncmov [#allocation2 + $0x4] }
  0x62   :  { %s186_s2 = vpop.sfrf %185 }
  0x63   :  { %p263_p0 = scmp.ne.s32.totalorder %s186_s2, 0 }
  0x65   :  { %190 = shalt.err (%p263_p0)  }
  0x66   :  { %192 = vsyncmov [#allocation2 + $0x5] }
  0x69   :  { %s193_s14 = vpop.sfrf %192 }
  0x6a   :  { %p264_p1 = scmp.ne.s32.totalorder %s193_s14, 0 }
  0x6c   :  { %197 = shalt.err (%p264_p1)  }
  0x6d   :  { %199 = vsyncmov [#allocation2 + $0x6] }
  0x70   :  { %s200_s20 = vpop.sfrf %199 }
  0x71   :  { %p265_p2 = scmp.ne.s32.totalorder %s200_s20, 0 }
  0x73   :  { %204 = shalt.err (%p265_p2)  }
  0x74   :  { %206 = vsyncmov [#allocation2 + $0x7] }
  0x77   :  { %s207_s21 = vpop.sfrf %206 }
  0x78   :  { %p266_p3 = scmp.ne.s32.totalorder %s207_s21, 0 }
  0x7a   :  { %211 = shalt.err (%p266_p3)  }

</bundles_post_ra>
